<compile_context>
chip_gen: v7x
topology: tpu7x:2x2x1
jax: 0.10.0
libtpu: 0.0.40
codegen_flags: <defaults>
</compile_context>

<pallas_src>
import functools
from collections import defaultdict

import numpy as np
import jax
import jax.numpy as jnp
from jax import lax
from jax.experimental import pallas as pl
from jax.experimental.pallas import tpu as pltpu


NUM_CORES = 2  # leading 'parallel' grid axis (v7x has 2 TCs; no-op elsewhere)


def _round_up(x, m):
    return ((x + m - 1) // m) * m


def _pick_tile(n_rows, d, budget_bytes=16 * 1024 * 1024):
    """Largest row tile whose double-buffered inputs fit the VMEM budget."""
    per_row = 3 * 2 * d * 4            # 3 inputs x 2 buffers x D x 4 B
    tm = max(8, budget_bytes // per_row)
    tm = min(tm, 2048)                 # per-step granularity cap
    tm = min(tm, _round_up(n_rows, 8))  # don't over-tile tiny problems
    return max(8, (tm // 8) * 8)


def _infonce_kernel(a_ref, p_ref, n_ref, out_ref, *,
                    inv_temp, n_rows, blocks_per_core):
    c = pl.program_id(0)   # core slice
    i = pl.program_id(1)   # row tile within the core slice
    tm = a_ref.shape[0]

    @pl.when(i == 0)
    def _():
        out_ref[...] = jnp.zeros_like(out_ref)

    a = a_ref[...].astype(jnp.float32)
    p = p_ref[...].astype(jnp.float32)
    n = n_ref[...].astype(jnp.float32)

    # 2-class cross entropy with label 0:
    #   loss = logsumexp([s_pos, s_neg]) - s_pos = softplus(s_neg - s_pos)
    # and s_neg - s_pos = sum(a * (n - p)) / T, so a single fused
    # sub + mul + reduce replaces two dot-product reductions.
    d = jnp.sum(a * (n - p), axis=-1, keepdims=True) * inv_temp   # (tm, 1)
    loss = jnp.maximum(d, 0.0) + jnp.log(1.0 + jnp.exp(-jnp.abs(d)))

    # In-kernel valid-row mask (global row index < n_rows).  Gates both the
    # ragged last tile and the clamped overhang tiles of the second core.
    row0 = (c * blocks_per_core + i) * tm
    rows = row0 + lax.broadcasted_iota(jnp.int32, (tm, 1), 0)
    loss = jnp.where(rows < n_rows, loss, 0.0)

    # Scalar accumulate, broadcast over the resident lane-dense out block.
    out_ref[...] += jnp.sum(loss)


def infonce_loss_pallas(anchor_emb, pos_emb, neg_emb, temperature=0.1, tm=None):
    """Mean InfoNCE (2-class CE) loss over gathered anchor/pos/neg rows."""
    A, D = anchor_emb.shape
    if tm is None:
        tm = _pick_tile(A, D)

    nb = -(-A // tm)                 # number of row tiles
    bpc = -(-nb // NUM_CORES)        # row tiles per core slice
    last_blk = nb - 1

    def in_map(c, i):
        # Clamp so a core's overhang tile re-reads the last valid tile;
        # its rows are >= A so the in-kernel mask zeroes its contribution.
        return (jnp.minimum(c * bpc + i, last_blk), 0)

    kernel = functools.partial(
        _infonce_kernel,
        inv_temp=1.0 / float(temperature),
        n_rows=A,
        blocks_per_core=bpc,
    )

    out = pl.pallas_call(
        kernel,
        out_shape=jax.ShapeDtypeStruct((NUM_CORES, 8, 128), jnp.float32),
        grid_spec=pltpu.PrefetchScalarGridSpec(
            num_scalar_prefetch=0,
            grid=(NUM_CORES, bpc),
            in_specs=[
                pl.BlockSpec((tm, D), in_map),
                pl.BlockSpec((tm, D), in_map),
                pl.BlockSpec((tm, D), in_map),
            ],
            out_specs=pl.BlockSpec((1, 8, 128), lambda c, i: (c, 0, 0)),
        ),
        compiler_params=pltpu.CompilerParams(
            dimension_semantics=("parallel", "arbitrary"),
            vmem_limit_bytes=32 * 1024 * 1024,
        ),
    )(anchor_emb, pos_emb, neg_emb)

    # every element of a core's out block holds that core's partial sum
    return jnp.sum(out[:, 0, 0]) / A


def build_triplet_indices(groups_np, rng):
    """Host-side glue replicating the PyTorch group_dict / randperm / randint
    index construction (data-dependent Python loop, not a kernel target)."""
    flat_groups = groups_np.reshape(-1)
    total = flat_groups.shape[0]
    group_dict = defaultdict(list)
    for idx in range(total):
        group_dict[int(flat_groups[idx])].append(idx)

    anchor_list, pos_list, neg_list = [], [], []
    all_indices = np.arange(total)
    for g, idxs in group_dict.items():
        idxs = np.asarray(idxs)
        if idxs.shape[0] < 2:
            continue
        perm = idxs[rng.permutation(idxs.shape[0])]
        pos = np.roll(perm, shift=1)
        complement = all_indices[flat_groups != g]
        if complement.size == 0:
            continue
        neg = complement[rng.integers(0, complement.size, size=idxs.shape[0])]
        anchor_list.append(perm)
        pos_list.append(pos)
        neg_list.append(neg)

    if len(anchor_list) == 0:
        return None
    return (np.concatenate(anchor_list),
            np.concatenate(pos_list),
            np.concatenate(neg_list))


def infonce_forward(embeddings, groups_np, temperature=0.1, host_rng=None):
    B, N, D = embeddings.shape
    flat_emb = embeddings.reshape(B * N, D)
    if host_rng is None:
        host_rng = np.random.default_rng(0)
    triplets = build_triplet_indices(groups_np, host_rng)
    if triplets is None:
        return jnp.float32(0.0)
    anchor_idx, pos_idx, neg_idx = triplets
    # keep native dtype (bf16 stays bf16 through the DMA; kernel upcasts)
    anchor_emb = jnp.take(flat_emb, jnp.asarray(anchor_idx), axis=0)
    pos_emb = jnp.take(flat_emb, jnp.asarray(pos_idx), axis=0)
    neg_emb = jnp.take(flat_emb, jnp.asarray(neg_idx), axis=0)
    return infonce_loss_pallas(anchor_emb, pos_emb, neg_emb, temperature)


def _reference_loss(anchor, pos, neg, temperature):
    a = anchor.astype(jnp.float32)
    p = pos.astype(jnp.float32)
    n = neg.astype(jnp.float32)
    s_pos = jnp.sum(a * p, axis=1) / temperature
    s_neg = jnp.sum(a * n, axis=1) / temperature
    logits = jnp.stack([s_pos, s_neg], axis=1)
    lse = jax.scipy.special.logsumexp(logits, axis=1)
    return jnp.mean(lse - logits[:, 0])


if __name__ == "__main__":
    key = jax.random.PRNGKey(0)
    k_emb, k_grp = jax.random.split(key)

    B, N, D = 2, 8, 32
    temperature = 0.1
    embeddings = jax.random.normal(k_emb, (B, N, D), dtype=jnp.float32)
    groups = jax.random.randint(k_grp, (B, N), 0, 3, dtype=jnp.int32)
    groups_np = np.asarray(groups)

    # deterministic host RNG for the (inherently random) triplet sampling
    host_rng = np.random.default_rng(0)
    loss = infonce_forward(embeddings, groups_np, temperature, host_rng)
    loss = jax.block_until_ready(loss)

    # cross-check against a pure-JAX reference on the same sampled triplets
    host_rng_ref = np.random.default_rng(0)
    triplets = build_triplet_indices(groups_np, host_rng_ref)
    flat_emb = embeddings.reshape(B * N, D)
    a_i, p_i, n_i = triplets
    ref = _reference_loss(jnp.take(flat_emb, jnp.asarray(a_i), axis=0),
                          jnp.take(flat_emb, jnp.asarray(p_i), axis=0),
                          jnp.take(flat_emb, jnp.asarray(n_i), axis=0),
                          temperature)
    assert np.allclose(np.asarray(loss), np.asarray(ref), rtol=1e-5, atol=1e-5), (
        loss, ref)

    print("KERNEL_OK")
</pallas_src>

<mosaic_0001>
module attributes {stable_mosaic.version = 11 : i64} {
  func.func @_infonce_kernel(%arg0: i32, %arg1: i32, %arg2: memref<16x32xf32, #tpu.memory_space<vmem>>, %arg3: memref<16x32xf32, #tpu.memory_space<vmem>>, %arg4: memref<16x32xf32, #tpu.memory_space<vmem>>, %arg5: memref<1x8x128xf32, #tpu.memory_space<vmem>>) attributes {dimension_semantics = [#tpu.dimension_semantics<parallel>, #tpu.dimension_semantics<arbitrary>], iteration_bounds = array<i64: 2, 1>, scalar_prefetch = 0 : i64, scratch_operands = 0 : i64, tpu.core_type = #tpu.core_type<tc>, window_params = [{transform_indices = @transform_0, window_bounds = array<i64: 16, 32>}, {transform_indices = @transform_1, window_bounds = array<i64: 16, 32>}, {transform_indices = @transform_2, window_bounds = array<i64: 16, 32>}, {transform_indices = @transform_3, window_bounds = array<i64: 1, 8, 128>}]} {
    %c0_i32 = arith.constant 0 : i32
    %0 = arith.cmpi eq, %arg1, %c0_i32 : i32
    %1 = arith.extui %0 : i1 to i32
    %c0_i32_0 = arith.constant 0 : i32
    %2 = arith.cmpi ne, %1, %c0_i32_0 : i32
    scf.if %2 {
      %cst_19 = arith.constant 0.000000e+00 : f32
      %40 = vector.broadcast %cst_19 : f32 to vector<1x8x128xf32>
      %c0_20 = arith.constant 0 : index
      %c0_21 = arith.constant 0 : index
      %c0_22 = arith.constant 0 : index
      %41 = vector.load %arg5[%c0_20, %c0_21, %c0_22] : memref<1x8x128xf32, #tpu.memory_space<vmem>>, vector<1x8x128xf32>
      tpu.vector_store %arg5[%c0_20, %c0_21, %c0_22], %40 {strides = array<i32>} : memref<1x8x128xf32, #tpu.memory_space<vmem>>, vector<1x8x128xf32>,
    } else {
    }
    %c0 = arith.constant 0 : index
    %c0_1 = arith.constant 0 : index
    %3 = vector.load %arg2[%c0, %c0_1] : memref<16x32xf32, #tpu.memory_space<vmem>>, vector<16x32xf32>
    %c0_2 = arith.constant 0 : index
    %c0_3 = arith.constant 0 : index
    %4 = vector.load %arg3[%c0_2, %c0_3] : memref<16x32xf32, #tpu.memory_space<vmem>>, vector<16x32xf32>
    %c0_4 = arith.constant 0 : index
    %c0_5 = arith.constant 0 : index
    %5 = vector.load %arg4[%c0_4, %c0_5] : memref<16x32xf32, #tpu.memory_space<vmem>>, vector<16x32xf32>
    %6 = arith.subf %5, %4 : vector<16x32xf32>
    %7 = arith.mulf %3, %6 : vector<16x32xf32>
    %cst = arith.constant dense<0.000000e+00> : vector<16xf32>
    %8 = vector.multi_reduction <add>, %7, %cst [1] : vector<16x32xf32> to vector<16xf32>
    %9 = vector.shape_cast %8 : vector<16xf32> to vector<16x1xf32>
    %cst_6 = arith.constant 1.000000e+01 : f32
    %10 = vector.broadcast %cst_6 : f32 to vector<16x1xf32>
    %11 = arith.mulf %9, %10 : vector<16x1xf32>
    %cst_7 = arith.constant 0.000000e+00 : f32
    %12 = vector.broadcast %cst_7 : f32 to vector<16x1xf32>
    %13 = arith.maximumf %11, %12 : vector<16x1xf32>
    %14 = math.absf %11 : vector<16x1xf32>
    %cst_8 = arith.constant 0.000000e+00 : f32
    %15 = vector.broadcast %cst_8 : f32 to vector<16x1xf32>
    %16 = arith.subf %15, %14 : vector<16x1xf32>
    %17 = math.exp %16 : vector<16x1xf32>
    %cst_9 = arith.constant 1.000000e+00 : f32
    %18 = vector.broadcast %cst_9 : f32 to vector<16x1xf32>
    %19 = arith.addf %18, %17 : vector<16x1xf32>
    %20 = math.log %19 : vector<16x1xf32>
    %21 = arith.addf %13, %20 : vector<16x1xf32>
    %c1_i32 = arith.constant 1 : i32
    %22 = arith.muli %arg0, %c1_i32 : i32
    %23 = arith.addi %22, %arg1 : i32
    %c16_i32 = arith.constant 16 : i32
    %24 = arith.muli %23, %c16_i32 : i32
    %25 = tpu.iota {dimensions = array<i32: 0>} : vector<16x1xi32>
    %26 = vector.broadcast %24 : i32 to vector<16x1xi32>
    %27 = arith.addi %26, %25 : vector<16x1xi32>
    %c16_i32_10 = arith.constant 16 : i32
    %28 = vector.broadcast %c16_i32_10 : i32 to vector<16x1xi32>
    %29 = arith.cmpi slt, %27, %28 : vector<16x1xi32>
    %cst_11 = arith.constant 0.000000e+00 : f32
    %30 = vector.broadcast %cst_11 : f32 to vector<16x1xf32>
    %31 = arith.select %29, %21, %30 : vector<16x1xi1>, vector<16x1xf32>
    %c0_12 = arith.constant 0 : index
    %c0_13 = arith.constant 0 : index
    %c0_14 = arith.constant 0 : index
    %32 = vector.load %arg5[%c0_12, %c0_13, %c0_14] : memref<1x8x128xf32, #tpu.memory_space<vmem>>, vector<1x8x128xf32>
    %33 = vector.shape_cast %31 : vector<16x1xf32> to vector<1x16x1xf32>
    %cst_15 = arith.constant dense<0.000000e+00> : vector<1xf32>
    %34 = vector.multi_reduction <add>, %33, %cst_15 [1, 2] : vector<1x16x1xf32> to vector<1xf32>
    %35 = vector.shape_cast %34 : vector<1xf32> to vector<1x1x1xf32>
    %36 = vector.extract %35[0, 0, 0] : f32 from vector<1x1x1xf32>
    %37 = vector.broadcast %36 : f32 to vector<1x8x128xf32>
    %38 = arith.addf %32, %37 : vector<1x8x128xf32>
    %c0_16 = arith.constant 0 : index
    %c0_17 = arith.constant 0 : index
    %c0_18 = arith.constant 0 : index
    %39 = vector.load %arg5[%c0_16, %c0_17, %c0_18] : memref<1x8x128xf32, #tpu.memory_space<vmem>>, vector<1x8x128xf32>
    tpu.vector_store %arg5[%c0_16, %c0_17, %c0_18], %38 {strides = array<i32>} : memref<1x8x128xf32, #tpu.memory_space<vmem>>, vector<1x8x128xf32>,
    return
  }
  func.func @transform_0(%arg0: i32, %arg1: i32) -> (i32, i32) {
    %c1_i32 = arith.constant 1 : i32
    %0 = arith.muli %arg0, %c1_i32 : i32
    %1 = arith.addi %0, %arg1 : i32
    %c0_i32 = arith.constant 0 : i32
    %2 = arith.minsi %1, %c0_i32 : i32
    %c0_i32_0 = arith.constant 0 : i32
    %c0_i32_1 = arith.constant 0 : i32
    return %2, %c0_i32_0 : i32, i32
  }
  func.func @transform_1(%arg0: i32, %arg1: i32) -> (i32, i32) {
    %c1_i32 = arith.constant 1 : i32
    %0 = arith.muli %arg0, %c1_i32 : i32
    %1 = arith.addi %0, %arg1 : i32
    %c0_i32 = arith.constant 0 : i32
    %2 = arith.minsi %1, %c0_i32 : i32
    %c0_i32_0 = arith.constant 0 : i32
    %c0_i32_1 = arith.constant 0 : i32
    return %2, %c0_i32_0 : i32, i32
  }
  func.func @transform_2(%arg0: i32, %arg1: i32) -> (i32, i32) {
    %c1_i32 = arith.constant 1 : i32
    %0 = arith.muli %arg0, %c1_i32 : i32
    %1 = arith.addi %0, %arg1 : i32
    %c0_i32 = arith.constant 0 : i32
    %2 = arith.minsi %1, %c0_i32 : i32
    %c0_i32_0 = arith.constant 0 : i32
    %c0_i32_1 = arith.constant 0 : i32
    return %2, %c0_i32_0 : i32, i32
  }
  func.func @transform_3(%arg0: i32, %arg1: i32) -> (i32, i32, i32) {
    %c0_i32 = arith.constant 0 : i32
    %c0_i32_0 = arith.constant 0 : i32
    %c0_i32_1 = arith.constant 0 : i32
    return %arg0, %c0_i32, %c0_i32_0 : i32, i32, i32
  }
}

</mosaic_0001>

<bundles_post_ra>
// kernel: tpu_custom_call.1
= control target key start
LH: loop header
LB: loop body
LE: loop exit
PB: predicated region body
PF: predicated region fallthrough
CT: control target
= control target key end

     0   :  { %s1128_s0 = inlined_call_operand.hbm [shape: f32[16,32], index: 0, kind: input, shape index: {}]   ;;  %s1129_s1 = inlined_call_operand.hbm [shape: f32[16,32], index: 1, kind: input, shape index: {}]   ;;  %s1130_s2 = inlined_call_operand.hbm [shape: f32[16,32], index: 2, kind: input, shape index: {}]   ;;  %s1131_s3 = inlined_call_operand.hbm [shape: f32[2,8,128], index: 3, kind: output, shape index: {}]  }
   0x1   :  { %1138 = sst [smem:[#allocation15_spill]] %s1129_s1 }
   0x2   :  { %8 = vsyncpa [#allocation3], 0 }
   0x3   :  { %10 = vsyncpa [#allocation3 + $0x1], 0 }
   0x4   :  { %11 = vsyncpa [#allocation6], 0 }
   0x5   :  { %13 = vsyncpa [#allocation6 + $0x1], 0 }
   0x6   :  { %14 = vsyncpa [#allocation4], 0 }
   0x7   :  { %16 = vsyncpa [#allocation4 + $0x1], 0  ;;  %s883_s12 = smov 0   ;;  %s885_s13 = smov 0  }
   0x8   :  { %s887_s14 = smov 0   ;;  %s889_s15 = smov 0  }
   0x9   :  { %s891_s16 = smov 0   ;;  %s893_s17 = smov 0  }
   0xa   :  { %s895_s18 = smov 0   ;;  %s897_s19 = smov 0  }
   0xb LB: > { %1139 = sst [smem:[#allocation12_spill]] %s851_s18  ;;  %s922_s20 = sadd.s32 4294967295, %s855_s19   ;;  %s855_s19 = sphi %s897_s19, %s22_s19   ;;  %s851_s18 = sphi %s895_s18, %s1160_s18   ;;  %s847_s17 = sphi %s893_s17, %s1159_s17   ;;  %s843_s16 = sphi %s891_s16, %s1118_s16   ;;  %s839_s15 = sphi %s889_s15, %s1164_s15   ;;  %s835_s14 = sphi %s887_s14, %s1163_s14   ;;  %s831_s13 = sphi %s885_s13, %s1162_s13   ;;  %s827_s12 = sphi %s883_s12, %s1161_s12  }
   0xc   : > { %s524_s21 = sadd.s32 4294967294, %s855_s19   ;;  %s34_s22 = sadd.s32 1, %s851_s18 }
   0xd   : > { %p36_p0 = scmp.ge.s32.totalorder %s34_s22, 2  ;;  %p824_p1 = scmp.ne.s32.totalorder %s843_s16, 0 }
   0xe   : > { %p55_p2 = scmp.eq.s32.totalorder %s855_s19, 0  ;;  %p60_p3 = scmp.ne.s32.totalorder %s843_s16, %s839_s15 }
   0xf   : > { %s1166_s22 = smov (%p36_p0, %s34_s22), 0  ;;  %p61_p5 = scmp.eq.s32.totalorder %s922_s20, 0 }
  0x10   : > { %1140 = sst [smem:[#allocation13_spill]] %s1166_s22  ;;  %p931_p4 = por %p824_p1, %p55_p2 }
  0x11   : > { %p936_p6 = por %p61_p5, %p60_p3  ;;  %s134_s25 = ssub.s32 %s851_s18, %s1166_s22 }
  0x12   : > { %p135_p7 = scmp.eq.s32.totalorder %s134_s25, 0  ;;  %s137_s26 = sadd.s32 1, %s835_s14 }
  0x13   : > { %s1142_s24 = scalar_select %p936_p6, 1, 0 }
  0x14   : > { %s944_s27 = scalar_select %p135_p7, %s835_s14, %s137_s26  }
  0x15   : > { %p147_p8 = scmp.ne.s32.totalorder %s835_s14, %s831_s13  ;;  %p148_p9 = scmp.eq.s32.totalorder %s922_s20, 1 }
  0x16   : > { %1143 = sst [smem:[#allocation14_spill]] %s944_s27  ;;  %p153_p10 = scmp.ne.s32.totalorder %s831_s13, %s827_s12 }
  0x17   : > { %p154_p11 = scmp.eq.s32.totalorder %s524_s21, 1  ;;  %p951_p12 = por %p148_p9, %p147_p8 }
  0x18   : > { %p573_p1 = scmp.lt.s32.totalorder %s855_s19, 2  ;;  %s198_s4 = sand.u32 1, %s855_s19  }
  0x19   : > { %s1144_s28 = scalar_select %p951_p12, 1, 0 }
  0x1a   : > { %p956_p0 = por %p154_p11, %p153_p10  ;;  %p963_p2 = pnand %p573_p1, %p931_p4 }
  0x1b   : > { %s857_s5 = smov [#allocation5]   ;;  %s971_s7 = scalar_lea.sflag [#allocation6], %s198_s4 }
  0x1c   : > { %s1145_s29 = scalar_select %p956_p0, 1, 0 }
  0x1d   : > { %s1146_s30 = scalar_select %p963_p2, 1, 0 }
  0x1e   : > { %s212_s6 = sshll.u32 %s857_s5, 4  ;;  %s1147_s1 = sld [smem:[#allocation15_spill]]  ;;  %s968_s6 = int_to_ptr.vmem [resolvable:$true] %s212_s6 }
  0x1f   : > { %p981_p5 = pneg %p963_p2 }
  0x24   : > { %s658_s10 = scalar_lea.hbm %s1147_s1, 256 }
  0x25   : > { %p659_p4 = scmp.ne.s32.totalorder %s1147_s1, %s658_s10  ;;  %p665_p9 = scmp.lt.u32.totalorder %s658_s10, %s658_s10 }
  0x26   : > { %p667_p10 = scmp.lt.u32.totalorder %s658_s10, %s1147_s1 }
  0x27   : > { %p661_p7 = pnand %p981_p5, %p659_p4 }
  0x28   : > { %p668_p11 = por %p667_p10, %p665_p9 }
  0x29   : > { %p662_p8 = pneg %p661_p7 }
  0x2b   : > { %p669_p1 = pnand %p668_p11, %p662_p8 }
  0x2d   : > { %672 = shalt.err (!%p669_p1)
}
  0x2e   : > { %s673_s26 = scalar_lea.vmem %s968_s6, 256  ;;  %s680_s4 = scalar_lea.vmem %s968_s6, 512 }
  0x2f   : > { %p674_p13 = scmp.ne.s32.totalorder %s968_s6, %s673_s26  ;;  %p681_p4 = scmp.lt.s32.totalorder %s968_s6, %s968_s6 }
  0x30   : > { %p682_p7 = scmp.lt.s32.totalorder %s680_s4, %s673_s26 }
  0x31   : > { %p676_p3 = pnand %p674_p13, %p981_p5 }
  0x32   : > { %p683_p12 = por %p682_p7, %p681_p4 }
  0x33   : > { %p677_p0 = pneg %p676_p3 }
  0x35   : > { %p684_p6 = pnand %p683_p12, %p677_p0 }
  0x37   : > { %687 = shalt.err (!%p684_p6)
}
  0x38   : > { %s858_s5 = smov 128   ;;  %s859_s8 = smov 8  }
  0x39   : > { %565 = dma.hbm_to_vmem [thread:$0]  (!%p963_p2), %s1147_s1, 256, %s968_s6, %s971_s7, %s858_s5, %s858_s5, %s859_s8  }
  0x3a   : > { %p244_p13 = scmp.lt.s32.totalorder %s855_s19, 3  ;;  %p1149_p3 = scmp.ge.s32.totalorder %s855_s19, 1 }
  0x3b   : > { %s860_s15 = smov [#allocation2]   ;;  %s688_s4 = scalar_lea.hbm %s1128_s0, 256 }
  0x3c   : > { %p1010_p12 = pnand %p1149_p3, %p244_p13  ;;  %s188_s23 = sshll.u32 %s860_s15, 4  ;;  %s189_s23 = int_to_ptr.vmem [resolvable:$true] %s188_s23 }
  0x3d   : > { %p689_p6 = scmp.ne.s32.totalorder %s1128_s0, %s688_s4  ;;  %p695_p9 = scmp.lt.u32.totalorder %s688_s4, %s688_s4 }
  0x3e   : > { %s1150_s11 = scalar_select %p1010_p12, 1, 0 }
  0x3f   : > { %p691_p0 = pnand %p689_p6, %p981_p5  ;;  %p697_p10 = scmp.lt.u32.totalorder %s688_s4, %s1128_s0 }
  0x41   : > { %p692_p8 = pneg %p691_p0  ;;  %p698_p11 = por %p697_p10, %p695_p9 }
  0x43   : > { %p699_p1 = pnand %p698_p11, %p692_p8 }
  0x45   : > { %702 = shalt.err (!%p699_p1)
}
  0x46   : > { %s703_s10 = scalar_lea.vmem %s189_s23, 256  ;;  %s710_s15 = scalar_lea.vmem %s189_s23, 512 }
  0x47   : > { %p704_p4 = scmp.ne.s32.totalorder %s189_s23, %s703_s10  ;;  %p711_p3 = scmp.lt.s32.totalorder %s189_s23, %s189_s23 }
  0x48   : > { %p712_p12 = scmp.lt.s32.totalorder %s710_s15, %s703_s10 }
  0x49   : > { %p706_p7 = pnand %p704_p4, %p981_p5 }
  0x4a   : > { %p713_p2 = por %p712_p12, %p711_p3 }
  0x4b   : > { %p707_p13 = pneg %p706_p7 }
  0x4d   : > { %p714_p6 = pnand %p713_p2, %p707_p13 }
  0x4f   : > { %717 = shalt.err (!%p714_p6)
}
  0x50   : > { %p1151_p0 = scmp.ne.s32.totalorder %s1146_s30, 0  ;;  %s861_s25 = smov [#allocation7]  }
  0x51   : > { %s236_s26 = sshll.u32 %s861_s25, 4  ;;  %s718_s9 = scalar_lea.hbm %s1130_s2, 256  ;;  %s237_s26 = int_to_ptr.vmem [resolvable:$true] %s236_s26 }
  0x52   : > { %562 = dma.hbm_to_vmem [thread:$0]  (!%p1151_p0), %s1128_s0, 256, %s189_s23, [#allocation3], %s858_s5, %s858_s5, %s859_s8  }
  0x53   : > { %p719_p2 = scmp.ne.s32.totalorder %s1130_s2, %s718_s9  ;;  %p725_p9 = scmp.lt.u32.totalorder %s718_s9, %s718_s9 }
  0x54   : > { %p727_p10 = scmp.lt.u32.totalorder %s718_s9, %s1130_s2 }
  0x55   : > { %p721_p12 = pnand %p719_p2, %p981_p5 }
  0x56   : > { %p728_p11 = por %p727_p10, %p725_p9 }
  0x57   : > { %p722_p8 = pneg %p721_p12 }
  0x59   : > { %p729_p1 = pnand %p728_p11, %p722_p8 }
  0x5b   : > { %732 = shalt.err (!%p729_p1)
}
  0x5c   : > { %s733_s23 = scalar_lea.vmem %s237_s26, 256  ;;  %s740_s18 = scalar_lea.vmem %s237_s26, 512 }
  0x5d   : > { %p734_p4 = scmp.ne.s32.totalorder %s237_s26, %s733_s23  ;;  %p741_p3 = scmp.lt.s32.totalorder %s237_s26, %s237_s26 }
  0x5e   : > { %p742_p6 = scmp.lt.s32.totalorder %s740_s18, %s733_s23 }
  0x5f   : > { %p736_p7 = pnand %p734_p4, %p981_p5 }
  0x60   : > { %p743_p0 = por %p742_p6, %p741_p3 }
  0x61   : > { %p737_p13 = pneg %p736_p7 }
  0x63   : > { %p744_p2 = pnand %p743_p0, %p737_p13 }
  0x65   : > { %747 = shalt.err (!%p744_p2)
}
  0x66   : > { %p1152_p12 = scmp.ne.s32.totalorder %s1146_s30, 0  ;;  %p1153_p8 = scmp.ne.s32.totalorder %s1150_s11, 0 }
  0x67   : > { %s250_s21 = sand.u32 (!%p1153_p8), 1, %s843_s16   ;;  %p1154_p5 = scmp.ne.s32.totalorder (!%p1153_p8), %s1142_s24, 0 }
  0x68   : > { %568 = dma.hbm_to_vmem [thread:$0]  (!%p1152_p12), %s1130_s2, 256, %s237_s26, %s971_s7, %s858_s5, %s858_s5, %s859_s8  }
  0x69   : > { %248 = sbr.rel (%p1153_p8) target bundleno = 529 (0x211), region = 32  ;;  %s537_s22 = sshll.u32 (!%p1153_p8), %s250_s21, 4 }
  0x6a   : > { %s251_s25 = scalar_lea.sflag (!%p1153_p8), [#allocation3], %s250_s21  ;;  %s254_s4 = scalar_lea.vmem (!%p1153_p8), [#allocation2], %s537_s22 }
  0x70   : > { %813 = dma.done.wait (%p1154_p5), %s251_s25, 256  }
  0x71   : > { %815 = vsyncadd (%p1154_p5), %s251_s25, 4294967040  ;;  %s259_s30 = sand.u32 1, %s922_s20   ;;  %s263_s9 = scalar_lea.vmem [#allocation5], %s537_s22 }
  0x72   : > { %s260_s6 = scalar_lea.sflag [#allocation6], %s259_s30 }
  0x73   : > { %817 = dma.done.wait (%p1154_p5), %s260_s6, 512  }
  0x74   : > { %819 = vsyncadd (%p1154_p5), %s260_s6, 4294966784  ;;  %v322_v0 = vld [vmem:[%s254_s4] sm:$0xff]  ;;  %s272_s7 = scalar_lea.vmem [#allocation7], %s537_s22  ;;  %v323_v4 = vld [vmem:[%s254_s4 + $0x8] sm:$0xff]  ;;  %vm332_vm0 = vcmask 261120   ;;  %v361_v26 = vlaneseq  ;;  %s541_s20 = sshll.u32 %s847_s17, 4 }
  0x75   : > { %v324_v1 = vld [vmem:[%s263_s9] sm:$0xff]  ;;  %v325_v5 = vld [vmem:[%s263_s9 + $0x8] sm:$0xff]  ;;  %v364_v28 = vstv %s541_s20  ;;  %vm372_vm3 = vcmask 7168   ;;  %s302_s24 = sand.u32 1, %s831_s13   ;;  %s543_s8 = sshll.u32 %s847_s17, 7 }
  0x76   : > { %v326_v2 = vld [vmem:[%s272_s7] sm:$0xff]  ;;  %v327_v6 = vld [vmem:[%s272_s7 + $0x8] sm:$0xff]  ;;  %v362_v27 = vshrl.u32 %v361_v26, 7  ;;  %s540_s5 = sshll.u32 %s302_s24, 3  ;;  %s1075_s18 = scalar_lea.hbm %s1131_s3, %s543_s8 }
  0x77   : > { %v328_v3 = vsub.f32 %v326_v2, %v324_v1  ;;  %v329_v7 = vsub.f32 %v327_v6, %v325_v5  ;;  %s304_s11 = scalar_lea.vmem [#allocation8], %s540_s5  ;;  %s389_s1 = scalar_lea.sflag [#allocation4], %s302_s24 }
  0x78   : > { %v363_v29 = vadd.s32 8, %v362_v27  ;;  %v365_v31 = vadd.s32 %v364_v28, %v362_v27  ;;  %s402_s26 = sshll.u32 %s304_s11, 4  ;;  %p1155_p9 = scmp.ne.s32.totalorder %s1144_s28, 0  ;;  %s1077_s26 = int_to_ptr.vmem [resolvable:$true] %s402_s26 }
  0x79   : > { %v330_v8 = vmul.f32 %v328_v3, %v322_v0  ;;  %v331_v9 = vmul.f32 %v329_v7, %v323_v4  ;;  %s748_s27 = scalar_lea.vmem %s1077_s26, 128  ;;  %s862_s17 = smov [#allocation8]  }
  0x7a   : > { %v366_v34 = vadd.s32 %v364_v28, %v363_v29  ;;  %vm367_vm1 = vcmp.lt.s32.totalorder %v365_v31, 16  ;;  %p749_p0 = scmp.ne.s32.totalorder %s1077_s26, %s748_s27  ;;  %s752_s21 = sshll.u32 %s862_s17, 4  ;;  %s753_s21 = int_to_ptr.vmem [resolvable:$false] %s752_s21 }
  0x7b   : > { %v333_v10 = vsel %vm332_vm0, %v330_v8, 0.0  ;;  %v336_v11 = vsel %vm332_vm0, %v331_v9, 0.0  ;;  %s754_s22 = scalar_lea.vmem %s753_s21, 256  ;;  %p755_p1 = scmp.lt.s32.totalorder %s1077_s26, %s753_s21 }
  0x7c   : > { %334 = vadd.xlane.f32.xlu0 %v333_v10  ;;  %vm368_vm2 = vcmp.lt.s32.totalorder %v366_v34, 16  ;;  %p750_p10 = pnand %p749_p0, %p1155_p9  ;;  %p756_p4 = scmp.lt.s32.totalorder %s754_s22, %s748_s27 }
  0x7e   : > { %p751_p11 = pneg %p750_p10  ;;  %p757_p7 = por %p756_p4, %p755_p1 }
  0x80   : > { %337 = vadd.xlane.f32.xlu0 %v336_v11  ;;  %p758_p13 = pnand %p757_p7, %p751_p11 }
 0x109   : > { %v335_v12 = vpop.xlane.xlu0 %334 }
 0x10a   : > { %v339_v13 = vmul.f32 10.0, %v335_v12 }
 0x10c   : > { %v343_v14 = vand.u32 2147483647, %v339_v13  ;;  %v341_v32 = vmax.f32 %v339_v13, 0.0 }
 0x10d   : > { %v338_v15 = vpop.xlane.xlu0 %337 }
 0x10e   : > { %v345_v16 = vsub.f32 0.0, %v343_v14  ;;  %v340_v17 = vmul.f32 10.0, %v338_v15 }
 0x110   : > { %v347_v18 = vmul.f32 1.442695, %v345_v16  ;;  %v344_v19 = vand.u32 2147483647, %v340_v17  ;;  %v342_v37 = vmax.f32 %v340_v17, 0.0 }
 0x112   : > { %650 = vpow2.f32 %v347_v18  ;;  %v346_v20 = vsub.f32 0.0, %v344_v19 }
 0x114   : > { %v349_v21 = vmul.f32 1.442695, %v346_v20 }
 0x116   : > { %652 = vpow2.f32 %v349_v21 }
 0x11c   : > { %v651_v22 = vpop.eup %650 }
 0x11d   : > { %v351_v23 = vadd.f32 1.0, %v651_v22 }
 0x11f   : > { %654 = vlog2.f32 %v351_v23 }
 0x120   : > { %v653_v24 = vpop.eup %652 }
 0x121   : > { %v352_v25 = vadd.f32 1.0, %v653_v24 }
 0x123   : > { %656 = vlog2.f32 %v352_v25 }
 0x129   : > { %v655_v30 = vpop.eup %654 }
 0x12a   : > { %v354_v33 = vmul.f32 0.6931472, %v655_v30 }
 0x12c   : > { %v357_v35 = vadd.f32 %v354_v33, %v341_v32 }
 0x12d   : > { %v657_v36 = vpop.eup %656 }
 0x12e   : > { %v356_v38 = vmul.f32 0.6931472, %v657_v36  ;;  %v369_v40 = vsel %vm367_vm1, %v357_v35, 0.0 }
 0x12f   : > { %v373_v42 = vsel %vm372_vm3, %v369_v40, 0.0 }
 0x130   : > { %v358_v39 = vadd.f32 %v356_v38, %v342_v37 }
 0x132   : > { %v370_v41 = vsel %vm368_vm2, %v358_v39, 0.0 }
 0x133   : > { %v374_v43 = vsel %vm372_vm3, %v370_v41, 0.0 }
 0x134   : > { %v375_v44 = vadd.f32 %v374_v43, %v373_v42 }
 0x136   : > { %376 = vadd.xlane.f32.xlu1 %v375_v44 }
 0x1c3   : > { %v377_v45 = vpop.xlane.xlu1 %376 }
 0x1c4   : > { %v378_v46 = vrot.slane %v377_v45, 4 }
 0x1c6   : > { %v379_v47 = vadd.f32 %v378_v46, %v377_v45 }
 0x1c8   : > { %v380_v48 = vrot.slane %v379_v47, 2 }
 0x1ca   : > { %v381_v49 = vadd.f32 %v380_v48, %v379_v47 }
 0x1cc   : > { %v382_v50 = vrot.slane %v381_v49, 1 }
 0x1ce   : > { %v383_v51 = vadd.f32 %v382_v50, %v381_v49 }
 0x1d0   : > { %549 = vpush %v383_v51 }
 0x201   : > { %s550_s10 = spop %549 }
 0x202   : > { %v385_v52 = vstv %s550_s10 }
 0x203   : > { %387 = vst [vmem:[%s304_s11] sm:$0xff] %v385_v52 }
 0x204   : > { %761 = shalt.err (!%p758_p13)
}
 0x205   : > { %s762_s25 = scalar_lea.hbm %s1075_s18, 128  ;;  %s766_s6 = scalar_lea.hbm %s1131_s3, 256 }
 0x206   : > { %p763_p3 = scmp.ne.s32.totalorder %s1075_s18, %s762_s25  ;;  %p767_p12 = scmp.lt.u32.totalorder %s1075_s18, %s1131_s3 }
 0x207   : > { %p768_p8 = scmp.lt.u32.totalorder %s766_s6, %s762_s25  ;;  %p770_p0 = scmp.lt.u32.totalorder %s762_s25, %s1075_s18 }
 0x208   : > { %p764_p6 = pnand %p763_p3, %p1155_p9 }
 0x209   : > { %p769_p5 = por %p768_p8, %p767_p12 }
 0x20a   : > { %p765_p2 = pneg %p764_p6 }
 0x20b   : > { %p771_p10 = por %p770_p0, %p769_p5 }
 0x20d   : > { %p772_p11 = pnand %p771_p10, %p765_p2 }
 0x20f   : > { %775 = shalt.err (!%p772_p11)
}
 0x210   : > { %557 = dma.vmem_to_hbm [thread:$0]  (%p1155_p9), %s1077_s26, 128, %s1075_s18, %s389_s1  }
 0x211 PF: > { %s414_s20 = sand.u32 1, %s827_s12   ;;  %p1156_p1 = scmp.ne.s32.totalorder %s1145_s29, 0 }
 0x212   : > { %p1157_p4 = scmp.ge.s32.totalorder %s855_s19, 2  ;;  %s415_s24 = scalar_lea.sflag [#allocation4], %s414_s20 }
 0x214   : > { %p570_p7 = pnand %p1157_p4, %p1156_p1 }
 0x216   : > { %821 = dma.done.wait (!%p570_p7), %s415_s24, 128  }
 0x217   : > { %823 = vsyncadd (!%p570_p7), %s415_s24, 4294967168  ;;  %s22_s19 = sadd.s32 1, %s855_s19   ;;  %s1158_s28 = sld [smem:[#allocation14_spill]] }
 0x218   : > { %p19_p13 = scmp.ge.s32.totalorder %s22_s19, 4   ;;  %s1159_s17 = sld [smem:[#allocation12_spill]] }
 0x219   : > { %s1160_s18 = sld [smem:[#allocation13_spill]]  ;;  %s1161_s12 = smov %s831_s13 }
 0x21a   : > { %s1162_s13 = smov %s835_s14  ;;  %s1164_s15 = smov %s843_s16 }
 0x21b   : > { %s1118_s16 = smov 0   ;;  %21 = sbr.rel (!%p19_p13) target bundleno = 11 (0xb), region = 105 }
 0x21d   : > { %s1163_s14 = smov %s1158_s28 }
 0x222   :  { %420 = vsyncpa [#allocation3], 1 }
 0x223   :  { %422 = vsyncpa [#allocation3 + $0x1], 1 }
 0x224   :  { %423 = vsyncpa [#allocation6], 1 }
 0x225   :  { %425 = vsyncpa [#allocation6 + $0x1], 1 }
 0x226   :  { %426 = vsyncpa [#allocation4], 1 }
 0x227   :  { %428 = vsyncpa [#allocation4 + $0x1], 1 }

</bundles_post_ra>
